<compile_context>
chip_gen: v6e
topology: v6e:2x2x1
jax: 0.10.0
libtpu: 0.0.40
codegen_flags: <defaults>
</compile_context>

<pallas_src>
import numpy as np
import jax
import jax.numpy as jnp
from jax.experimental import pallas as pl
from jax.experimental.pallas import tpu as pltpu


# ---------------------------------------------------------------------------
# Kernels
# ---------------------------------------------------------------------------
def _absmean_kernel(x_ref, o_ref):
    # x_ref: (TILE_R, HW) block; per-row mean of |x| over the lane axis.
    ax = jnp.abs(x_ref[...].astype(jnp.float32))
    o_ref[...] = jnp.mean(ax, axis=1, keepdims=True)            # (TILE_R, 1)


def _fc_thresh_kernel(avg_ref, w1_ref, b1_ref, gamma_ref, beta_ref,
                      w2_ref, b2_ref, t_ref):
    # Tiny fused head: Linear -> BatchNorm1d (training batch stats) ->
    # LeakyReLU(0.2) -> Linear -> Sigmoid, then threshold = avg * sigmoid(.).
    avg = avg_ref[...]                                           # (N, C)
    z = jnp.dot(avg, w1_ref[...],
                preferred_element_type=jnp.float32) + b1_ref[...]
    mu = jnp.mean(z, axis=0, keepdims=True)                      # over batch N
    zc = z - mu
    var = jnp.mean(zc * zc, axis=0, keepdims=True)               # biased var
    h = zc * jax.lax.rsqrt(var + 1e-5)
    h = h * gamma_ref[...] + beta_ref[...]
    h = jnp.where(h >= 0.0, h, 0.2 * h)                          # LeakyReLU
    z2 = jnp.dot(h, w2_ref[...],
                 preferred_element_type=jnp.float32) + b2_ref[...]
    scale = 1.0 / (1.0 + jnp.exp(-z2))                           # Sigmoid (EUP)
    t_ref[...] = avg * scale                                     # (N, C)


def _soft_threshold_kernel(x_ref, t_ref, o_ref):
    # out = sign(x) * max(|x| - thr, 0); since thr >= 0 this is exactly
    # x - clip(x, -thr, thr)  (min, max, sub: fewer VALU ops, same result).
    x = x_ref[...].astype(jnp.float32)                           # (TILE_R, HW)
    thr = t_ref[...]                                             # (TILE_R, 1)
    o_ref[...] = (x - jnp.clip(x, -thr, thr)).astype(o_ref.dtype)


# ---------------------------------------------------------------------------
# Wrapper
# ---------------------------------------------------------------------------
def _pick_tile_rows(num_rows, hw, target_bytes=2 << 20):
    """Rows per block; lane axis carries the full H*W. ~2 MiB blocks keep the
    double-buffered in+out tiles well inside every chip's scoped VMEM."""
    if num_rows <= 8:
        return num_rows
    t = min(num_rows, max(8, target_bytes // (hw * 4)))
    if t >= num_rows:
        return num_rows
    return max(8, (t // 8) * 8)


def shrinkage_forward(x, w1, b1, gamma, beta, w2, b2):
    # x: (N, C, H, W) NCHW.  gap_size is 1 (required by the Linear(C, C) head).
    N, C, H, W = x.shape
    R, HW = N * C, H * W
    x2d = x.reshape(R, HW)

    TILE_R = _pick_tile_rows(R, HW)
    grid_r = pl.cdiv(R, TILE_R)

    # VMEM headroom: big in-tile + big out-tile, double-buffered, plus slack.
    # TODO(synk): for very large H*W (> ~1.5M elems/row) the lane axis itself
    # would need tiling; typical DRSN spatial sizes are far below that.
    tile_bytes = TILE_R * HW * 4
    vmem_limit = int(min(100 << 20, max(32 << 20, 4 * tile_bytes + (2 << 20))))

    # ---- Pass 1: per-(n, c) mean of |x| over H*W (tiled, parallel) ---------
    avg = pl.pallas_call(
        _absmean_kernel,
        out_shape=jax.ShapeDtypeStruct((R, 1), jnp.float32),
        grid=(grid_r,),
        in_specs=[pl.BlockSpec((TILE_R, HW), lambda i: (i, 0))],
        out_specs=pl.BlockSpec((TILE_R, 1), lambda i: (i, 0)),
        compiler_params=pltpu.CompilerParams(
            dimension_semantics=("parallel",),
            vmem_limit_bytes=vmem_limit),
        cost_estimate=pl.CostEstimate(
            flops=2 * R * HW, transcendentals=0,
            bytes_accessed=4 * (R * HW + R)),
    )(x2d)
    avg_nc = avg.reshape(N, C)

    # ---- Pass 2: tiny fused FC / BN1d / LeakyReLU / FC / Sigmoid -----------
    # Everything here is (N, C) / (C, C) sized: one small kernel call.
    thresh = pl.pallas_call(
        _fc_thresh_kernel,
        out_shape=jax.ShapeDtypeStruct((N, C), jnp.float32),
        grid=(1,),
        in_specs=[pl.BlockSpec((N, C), lambda i: (0, 0)),
                  pl.BlockSpec((C, C), lambda i: (0, 0)),
                  pl.BlockSpec((1, C), lambda i: (0, 0)),
                  pl.BlockSpec((1, C), lambda i: (0, 0)),
                  pl.BlockSpec((1, C), lambda i: (0, 0)),
                  pl.BlockSpec((C, C), lambda i: (0, 0)),
                  pl.BlockSpec((1, C), lambda i: (0, 0))],
        out_specs=pl.BlockSpec((N, C), lambda i: (0, 0)),
        cost_estimate=pl.CostEstimate(
            flops=4 * N * C * C + 12 * N * C, transcendentals=N * C,
            bytes_accessed=4 * (2 * N * C + 2 * C * C + 5 * C)),
    )(avg_nc,
      w1.T.astype(jnp.float32),              # so avg @ w1t == avg @ W1.T
      b1.reshape(1, C).astype(jnp.float32),
      gamma.reshape(1, C).astype(jnp.float32),
      beta.reshape(1, C).astype(jnp.float32),
      w2.T.astype(jnp.float32),
      b2.reshape(1, C).astype(jnp.float32))

    thresh_r = thresh.reshape(R, 1)

    # ---- Pass 3: soft-threshold apply (tiled, parallel, lane-dense) --------
    out2d = pl.pallas_call(
        _soft_threshold_kernel,
        out_shape=jax.ShapeDtypeStruct((R, HW), x.dtype),
        grid=(grid_r,),
        in_specs=[pl.BlockSpec((TILE_R, HW), lambda i: (i, 0)),
                  pl.BlockSpec((TILE_R, 1), lambda i: (i, 0))],
        out_specs=pl.BlockSpec((TILE_R, HW), lambda i: (i, 0)),
        compiler_params=pltpu.CompilerParams(
            dimension_semantics=("parallel",),
            vmem_limit_bytes=vmem_limit),
        cost_estimate=pl.CostEstimate(
            flops=3 * R * HW, transcendentals=0,
            bytes_accessed=4 * (2 * R * HW + R)),
    )(x2d, thresh_r)

    return out2d.reshape(N, C, H, W)


# ---------------------------------------------------------------------------
# Demo + reference check
# ---------------------------------------------------------------------------
if __name__ == "__main__":
    key = jax.random.PRNGKey(0)
    k1, k2, k3, k4, k5 = jax.random.split(key, 5)

    N, C, H, W = 2, 4, 16, 16
    x = jax.random.normal(k1, (N, C, H, W), dtype=jnp.float32)

    # nn.Linear(C, C) style init (deterministic), BatchNorm1d defaults.
    bound = 1.0 / np.sqrt(C)
    w1 = jax.random.uniform(k2, (C, C), jnp.float32, -bound, bound)
    b1 = jax.random.uniform(k3, (C,), jnp.float32, -bound, bound)
    w2 = jax.random.uniform(k4, (C, C), jnp.float32, -bound, bound)
    b2 = jax.random.uniform(k5, (C,), jnp.float32, -bound, bound)
    gamma = jnp.ones((C,), jnp.float32)    # BatchNorm1d default weight
    beta = jnp.zeros((C,), jnp.float32)    # BatchNorm1d default bias

    out = shrinkage_forward(x, w1, b1, gamma, beta, w2, b2)
    out = jax.block_until_ready(out)
    assert out.shape == (N, C, H, W)

    # Pure-JAX reference (same math, different execution path).
    x_abs = jnp.abs(x)
    avg = x_abs.mean(axis=(2, 3))                                  # (N, C)
    z = avg @ w1.T + b1
    mu = z.mean(axis=0, keepdims=True)
    var = ((z - mu) ** 2).mean(axis=0, keepdims=True)              # biased
    h = (z - mu) * jax.lax.rsqrt(var + 1e-5) * gamma + beta
    h = jnp.where(h >= 0, h, 0.2 * h)
    s = jax.nn.sigmoid(h @ w2.T + b2)
    thr = (avg * s)[:, :, None, None]
    ref = jnp.sign(x) * jnp.maximum(x_abs - thr, 0.0)

    assert jnp.allclose(out, ref, atol=1e-4, rtol=1e-4), "mismatch vs JAX ref"
    print("KERNEL_OK")
</pallas_src>

<mosaic_0001>
module attributes {stable_mosaic.version = 11 : i64} {
  func.func @_absmean_kernel(%arg0: i32, %arg1: memref<8x256xf32, #tpu.memory_space<vmem>>, %arg2: memref<8x1xf32, #tpu.memory_space<vmem>>) attributes {dimension_semantics = [#tpu.dimension_semantics<parallel>], iteration_bounds = array<i64: 1>, scalar_prefetch = 0 : i64, scratch_operands = 0 : i64, tpu.core_type = #tpu.core_type<tc>, window_params = [{transform_indices = @transform_0, window_bounds = array<i64: 8, 256>}, {transform_indices = @transform_1, window_bounds = array<i64: 8, 1>}]} {
    %c0 = arith.constant 0 : index
    %c0_0 = arith.constant 0 : index
    %0 = vector.load %arg1[%c0, %c0_0] : memref<8x256xf32, #tpu.memory_space<vmem>>, vector<8x256xf32>
    %1 = math.absf %0 : vector<8x256xf32>
    %cst = arith.constant dense<0.000000e+00> : vector<8xf32>
    %2 = vector.multi_reduction <add>, %1, %cst [1] : vector<8x256xf32> to vector<8xf32>
    %3 = vector.shape_cast %2 : vector<8xf32> to vector<8x1xf32>
    %cst_1 = arith.constant 2.560000e+02 : f32
    %4 = vector.broadcast %cst_1 : f32 to vector<8x1xf32>
    %5 = arith.divf %3, %4 : vector<8x1xf32>
    %c0_2 = arith.constant 0 : index
    %c0_3 = arith.constant 0 : index
    %6 = vector.load %arg2[%c0_2, %c0_3] : memref<8x1xf32, #tpu.memory_space<vmem>>, vector<8x1xf32>
    tpu.vector_store %arg2[%c0_2, %c0_3], %5 {strides = array<i32>} : memref<8x1xf32, #tpu.memory_space<vmem>>, vector<8x1xf32>,
    return
  }
  func.func @transform_0(%arg0: i32) -> (i32, i32) {
    %c0_i32 = arith.constant 0 : i32
    %c0_i32_0 = arith.constant 0 : i32
    return %arg0, %c0_i32 : i32, i32
  }
  func.func @transform_1(%arg0: i32) -> (i32, i32) {
    %c0_i32 = arith.constant 0 : i32
    %c0_i32_0 = arith.constant 0 : i32
    return %arg0, %c0_i32 : i32, i32
  }
}

</mosaic_0001>

<bundles_post_ra>
// kernel: tpu_custom_call.1
= control target key start
LH: loop header
LB: loop body
LE: loop exit
PB: predicated region body
PF: predicated region fallthrough
CT: control target
= control target key end

     0   :  { %6 = vsyncpa [#allocation3], 0  ;;  %s59_s6 = smov [#allocation2]   ;;  %s76_s0 = inlined_call_operand.hbm [shape: f32[8,256], index: 0, kind: input, shape index: {}]   ;;  %s77_s1 = inlined_call_operand.vmem [shape: f32[8,1], index: 1, kind: output, shape index: {}]  }
   0x1   :  { %s13_s7 = sshll.u32 %s59_s6, 4  ;;  %s14_s7 = int_to_ptr.vmem [resolvable:$true] %s13_s7 }
   0x2   :  { %s45_s8 = scalar_lea.vmem %s14_s7, 256  ;;  %p50_p1 = scmp.lt.s32.totalorder %s14_s7, %s14_s7 }
   0x3   :  { %p46_p0 = scmp.ne.s32.totalorder %s14_s7, %s45_s8  ;;  %p51_p2 = scmp.lt.s32.totalorder %s45_s8, %s45_s8 }
   0x5   :  { %p52_p3 = por %p51_p2, %p50_p1 }
   0x7   :  { %p53_p4 = pnand %p52_p3, %p46_p0 }
   0x9   :  { %56 = shalt.err (!%p53_p4)
}
   0xa   :  { %16 = dma.hbm_to_vmem [thread:$0]  %s76_s0, 256, %s14_s7, [#allocation3]  }
   0xb   :  { %57 = dma.done.wait [#allocation3], 256  }
   0xc   :  { %58 = vsyncadd [#allocation3], 4294967040  ;;  %v20_v0 = vld [vmem:[#allocation2] sm:$0xff]  ;;  %v21_v1 = vld [vmem:[#allocation2 + $0x8] sm:$0xff]  ;;  %vm29_vm0 = vcmask 7168  }
   0xd   :  { %v22_v2 = vand.u32 2147483647, %v20_v0  ;;  %v23_v3 = vand.u32 2147483647, %v21_v1 }
   0xf   :  { %v24_v4 = vadd.f32 %v23_v3, %v22_v2 }
  0x11   :  { %25 = vadd.xlane.f32.xlu0 %v24_v4 }
  0x9a   :  { %v26_v5 = vpop.xlane.xlu0 %25 }
  0x9b   :  { %v28_v6 = vmul.f32 0.00390625, %v26_v5 }
  0x9d   :  { %30 = vst.msk [vmem:[%s77_s1] sm:$0xff] %vm29_vm0, %v28_v6 }
  0x9e   :  { %35 = vsyncpa [#allocation3], 1 }

</bundles_post_ra>
